<compile_context>
chip_gen: v7x
topology: tpu7x:2x2x1
jax: 0.10.0
libtpu: 0.0.40
codegen_flags: <defaults>
</compile_context>

<pallas_src>
import jax
import jax.numpy as jnp
from jax.experimental import pallas as pl
from jax.experimental.pallas import tpu as pltpu


def _round_up(x, m):
    return (x + m - 1) // m * m


def _make_gather_kernel(token_tile):
    """Per-tile gather: DMA `token_tile` table rows (selected by prefetched
    ids) from HBM into a VMEM buffer, then store the tile to the output."""

    def kernel(ids_ref, table_hbm, out_ref, rows_vmem, sems):
        # ids_ref   : SMEM (N_pad,) int32   -- scalar-prefetched token ids
        # table_hbm : ANY  (V, H)  float32  -- embedding table, stays in HBM
        # out_ref   : VMEM (TN, H) float32  -- pipelined output tile
        # rows_vmem : VMEM (TN, H) float32  -- DMA landing buffer
        # sems      : DMA semaphore (1,)    -- shared by all row copies
        base = pl.program_id(0) * token_tile

        # Issue all row gathers for this tile (they overlap in the DMA engine).
        @pl.loop(0, token_tile)
        def _issue(j):
            row = ids_ref[base + j]
            pltpu.make_async_copy(
                table_hbm.at[row], rows_vmem.at[j], sems.at[0]
            ).start()

        # Drain: wait once per issued copy (identical sizes, shared sem), so
        # after this loop every row has landed in rows_vmem.
        @pl.loop(0, token_tile)
        def _drain(j):
            pltpu.make_async_copy(
                table_hbm.at[0], rows_vmem.at[j], sems.at[0]
            ).wait()

        out_ref[...] = rows_vmem[...]

    return kernel


def desc_embedding_forward(ids, table, *, token_tile=128):
    """ids: [S, L] int; table: [V, H] float32 -> [S, L, H] float32."""
    S, L = ids.shape
    V, H = table.shape
    N = S * L

    # Tile of tokens per grid step; shrink for tiny inputs, pad N otherwise.
    tn = min(token_tile, _round_up(N, 8))
    n_pad = _round_up(N, tn)

    ids_flat = ids.reshape(N).astype(jnp.int32)
    if n_pad != N:
        # pad with id 0 (the zeroed padding row); padded rows are sliced off.
        ids_flat = jnp.concatenate(
            [ids_flat, jnp.zeros((n_pad - N,), jnp.int32)]
        )

    itemsize = jnp.dtype(table.dtype).itemsize
    cost = pl.CostEstimate(
        flops=0,
        transcendentals=0,
        # read N rows from the table + write N rows of output + read the ids
        bytes_accessed=2 * n_pad * H * itemsize + n_pad * 4,
    )

    out_flat = pl.pallas_call(
        _make_gather_kernel(tn),
        out_shape=jax.ShapeDtypeStruct((n_pad, H), table.dtype),
        grid_spec=pltpu.PrefetchScalarGridSpec(
            num_scalar_prefetch=1,                 # ids -> SMEM, one DMA total
            grid=(n_pad // tn,),
            in_specs=[
                pl.BlockSpec(memory_space=pl.ANY),  # table stays in HBM
            ],
            out_specs=pl.BlockSpec((tn, H), lambda i, ids_ref: (i, 0)),
            scratch_shapes=[
                pltpu.VMEM((tn, H), table.dtype),   # gather landing buffer
                pltpu.SemaphoreType.DMA((1,)),      # shared DMA semaphore
            ],
        ),
        compiler_params=pltpu.CompilerParams(
            dimension_semantics=("parallel",),
        ),
        cost_estimate=cost,
    )(ids_flat, table)

    return out_flat[:N].reshape(S, L, H)


def init_embedding_table(key, word_num, h_dim):
    """nn.Embedding(word_num + 1, h_dim, padding_idx=0): N(0,1) init, row 0 zeroed."""
    V = word_num + 1
    table = jax.random.normal(key, (V, h_dim), dtype=jnp.float32)
    table = table.at[0].set(0.0)  # padding_idx=0
    return table


if __name__ == "__main__":
    key = jax.random.PRNGKey(0)
    k_tab, k_ids = jax.random.split(key)

    # Small, module-consistent shapes.
    word_num = 511          # vocab size (table has word_num + 1 = 512 rows)
    h_dim = 128             # embedding dim
    S, L = 2, 8             # 2 descriptions, 8 word ids each

    table = init_embedding_table(k_tab, word_num, h_dim)

    ids = jax.random.randint(k_ids, (S, L), minval=0, maxval=word_num + 1,
                             dtype=jnp.int32)
    # force some padding ids to exercise padding_idx=0
    ids = ids.at[0, 0].set(0).at[1, 3].set(0)

    out = jax.block_until_ready(desc_embedding_forward(ids, table))

    # Reference check (plain JAX gather == torch.stack of embedding lookups).
    ref = jnp.take(table, ids.reshape(-1), axis=0).reshape(S, L, h_dim)
    assert out.shape == (S, L, h_dim)
    assert jnp.array_equal(out, ref)      # pure row copy -> bit-exact
    assert jnp.all(out[0, 0] == 0.0) and jnp.all(out[1, 3] == 0.0)

    print("KERNEL_OK")
</pallas_src>

<mosaic_0001>
module attributes {stable_mosaic.version = 11 : i64} {
  func.func @kernel(%arg0: i32, %arg1: memref<16xi32, #tpu.memory_space<smem>>, %arg2: memref<512x128xf32, #tpu.memory_space<any>>, %arg3: memref<16x128xf32, #tpu.memory_space<vmem>>, %arg4: memref<16x128xf32, #tpu.memory_space<vmem>>, %arg5: memref<1x!tpu.dma_semaphore, #tpu.memory_space<semaphore_mem>>) attributes {dimension_semantics = [#tpu.dimension_semantics<parallel>], iteration_bounds = array<i64: 1>, scalar_prefetch = 1 : i64, scratch_operands = 2 : i64, tpu.core_type = #tpu.core_type<tc>, window_params = [{}, {transform_indices = @transform_1, window_bounds = array<i64: 16, 128>}]} {
    %c16_i32 = arith.constant 16 : i32
    %0 = arith.muli %arg0, %c16_i32 : i32
    %c0_i32 = arith.constant 0 : i32
    %c16_i32_0 = arith.constant 16 : i32
    %1 = arith.addi %c0_i32, %c16_i32_0 : i32
    %c1_i32 = arith.constant 1 : i32
    scf.for %arg6 = %c0_i32 to %1 step %c1_i32  : i32 {
      %c1_i32_9 = arith.constant 1 : i32
      %5 = arith.muli %arg6, %c1_i32_9 : i32
      %c0_i32_10 = arith.constant 0 : i32
      %6 = arith.addi %c0_i32_10, %5 : i32
      %7 = arith.addi %0, %6 : i32
      %8 = arith.index_cast %7 : i32 to index
      %9 = memref.load %arg1[%8] : memref<16xi32, #tpu.memory_space<smem>>
      %c0_i32_11 = arith.constant 0 : i32
      %c0_i32_12 = arith.constant 0 : i32
      %10 = tpu.memref_slice %arg2[%9, %c0_i32_12] : memref<512x128xf32, #tpu.memory_space<any>> -> memref<1x128xf32, #tpu.memory_space<any>>
      %11 = tpu.memref_squeeze %10 : memref<1x128xf32, #tpu.memory_space<any>> -> memref<128xf32, #tpu.memory_space<any>>
      %c0_i32_13 = arith.constant 0 : i32
      %12 = tpu.memref_slice %arg4[%6, %c0_i32_13] : memref<16x128xf32, #tpu.memory_space<vmem>> -> memref<1x128xf32, #tpu.memory_space<vmem>>
      %13 = tpu.memref_squeeze %12 : memref<1x128xf32, #tpu.memory_space<vmem>> -> memref<128xf32, #tpu.memory_space<vmem>>
      %14 = tpu.memref_slice %arg5[%c0_i32_11] : memref<1x!tpu.dma_semaphore, #tpu.memory_space<semaphore_mem>> -> memref<1x!tpu.dma_semaphore, #tpu.memory_space<semaphore_mem>>
      %15 = tpu.memref_squeeze %14 : memref<1x!tpu.dma_semaphore, #tpu.memory_space<semaphore_mem>> -> memref<!tpu.dma_semaphore, #tpu.memory_space<semaphore_mem>>
      tpu.enqueue_dma source(%11 : memref<128xf32, #tpu.memory_space<any>>) target(%13 : memref<128xf32, #tpu.memory_space<vmem>>) target_semaphore(%15 : memref<!tpu.dma_semaphore, #tpu.memory_space<semaphore_mem>>)
    }
    %c16_i32_1 = arith.constant 16 : i32
    %c0_i32_2 = arith.constant 0 : i32
    %c16_i32_3 = arith.constant 16 : i32
    %2 = arith.addi %c0_i32_2, %c16_i32_3 : i32
    %c1_i32_4 = arith.constant 1 : i32
    scf.for %arg6 = %c0_i32_2 to %2 step %c1_i32_4  : i32 {
      %c1_i32_9 = arith.constant 1 : i32
      %5 = arith.muli %arg6, %c1_i32_9 : i32
      %c0_i32_10 = arith.constant 0 : i32
      %6 = arith.addi %c0_i32_10, %5 : i32
      %c0_i32_11 = arith.constant 0 : i32
      %c0_i32_12 = arith.constant 0 : i32
      %c0_i32_13 = arith.constant 0 : i32
      %7 = tpu.memref_slice %arg2[%c0_i32_11, %c0_i32_13] : memref<512x128xf32, #tpu.memory_space<any>> -> memref<1x128xf32, #tpu.memory_space<any>>
      %8 = tpu.memref_squeeze %7 : memref<1x128xf32, #tpu.memory_space<any>> -> memref<128xf32, #tpu.memory_space<any>>
      %c0_i32_14 = arith.constant 0 : i32
      %9 = tpu.memref_slice %arg4[%6, %c0_i32_14] : memref<16x128xf32, #tpu.memory_space<vmem>> -> memref<1x128xf32, #tpu.memory_space<vmem>>
      %10 = tpu.memref_squeeze %9 : memref<1x128xf32, #tpu.memory_space<vmem>> -> memref<128xf32, #tpu.memory_space<vmem>>
      %11 = tpu.memref_slice %arg5[%c0_i32_12] : memref<1x!tpu.dma_semaphore, #tpu.memory_space<semaphore_mem>> -> memref<1x!tpu.dma_semaphore, #tpu.memory_space<semaphore_mem>>
      %12 = tpu.memref_squeeze %11 : memref<1x!tpu.dma_semaphore, #tpu.memory_space<semaphore_mem>> -> memref<!tpu.dma_semaphore, #tpu.memory_space<semaphore_mem>>
      tpu.wait_dma2 semaphore(%12 : memref<!tpu.dma_semaphore, #tpu.memory_space<semaphore_mem>>) src(%8 : memref<128xf32, #tpu.memory_space<any>>) dst(%10 : memref<128xf32, #tpu.memory_space<vmem>>)
    }
    %c16_i32_5 = arith.constant 16 : i32
    %c0 = arith.constant 0 : index
    %c0_6 = arith.constant 0 : index
    %3 = vector.load %arg4[%c0, %c0_6] : memref<16x128xf32, #tpu.memory_space<vmem>>, vector<16x128xf32>
    %c0_7 = arith.constant 0 : index
    %c0_8 = arith.constant 0 : index
    %4 = vector.load %arg3[%c0_7, %c0_8] : memref<16x128xf32, #tpu.memory_space<vmem>>, vector<16x128xf32>
    tpu.vector_store %arg3[%c0_7, %c0_8], %3 {strides = array<i32>} : memref<16x128xf32, #tpu.memory_space<vmem>>, vector<16x128xf32>,
    return
  }
  func.func @transform_1(%arg0: i32, %arg1: memref<16xi32, #tpu.memory_space<smem>>) -> (i32, i32) {
    %c0_i32 = arith.constant 0 : i32
    %c0_i32_0 = arith.constant 0 : i32
    return %arg0, %c0_i32 : i32, i32
  }
}

</mosaic_0001>

<bundles_post_ra>
// kernel: tpu_custom_call.1
= control target key start
LH: loop header
LB: loop body
LE: loop exit
PB: predicated region body
PF: predicated region fallthrough
CT: control target
= control target key end

     0   :  { %s245_s0 = inlined_call_operand.hbm [shape: s32[16], index: 0, kind: input, shape index: {}]   ;;  %s246_s1 = inlined_call_operand.hbm [shape: f32[512,128], index: 1, kind: input, shape index: {}]   ;;  %s247_s2 = inlined_call_operand.hbm [shape: f32[16,128], index: 2, kind: output, shape index: {}]  }
   0x1   :  { %s104_s11 = scalar_lea.hbm %s245_s0, 16 }
   0x2   :  { %p105_p0 = scmp.ne.s32.totalorder %s245_s0, %s104_s11  ;;  %p108_p1 = scmp.lt.u32.totalorder %s104_s11, %s245_s0 }
   0x4   :  { %p110_p2 = pnand %p108_p1, %p105_p0 }
   0x6   :  { %113 = shalt.err (!%p110_p2)  }
   0x7   :  { %s182_s16 = smov [#allocation5]  }
   0x8   :  { %8 = dma.hbm_to_smem %s245_s0, 16, %s182_s16, [#allocation4] }
   0x9   :  { %168 = dma.done.wait [#allocation4], 16 }
   0xa   :  { %169 = vsyncadd [#allocation4], 4294967280 }
   0xb   :  { %10 = sfence }
   0xc   :  { %11 = vsyncpa [#allocation7], 0  ;;  %s214_s19 = smov 0  }
   0xd LB: > { %s20_s20 = sld [smem:[#allocation5 + %s176_s19]]  ;;  %s23_s21 = scalar_lea.vmem [#allocation2], %s176_s19  ;;  %s176_s19 = sphi %s214_s19, %s18_s19  }
   0xe   : > { %s31_s22 = sshll.u32 %s23_s21, 4  ;;  %s116_s29 = scalar_lea.hbm %s246_s1, 8192  ;;  %s32_s22 = int_to_ptr.vmem [resolvable:$true] %s31_s22 }
  0x13   : > { %s82_s23 = sshll.u32 %s20_s20, 4 }
  0x14   : > { %s22_s25 = scalar_lea.hbm %s246_s1, %s82_s23 }
  0x15   : > { %s114_s26 = scalar_lea.hbm %s22_s25, 16  ;;  %p117_p4 = scmp.lt.u32.totalorder %s22_s25, %s246_s1 }
  0x16   : > { %p115_p3 = scmp.ne.s32.totalorder %s22_s25, %s114_s26  ;;  %p118_p5 = scmp.lt.u32.totalorder %s116_s29, %s114_s26 }
  0x17   : > { %p120_p7 = scmp.lt.u32.totalorder %s114_s26, %s22_s25 }
  0x18   : > { %p119_p6 = por %p118_p5, %p117_p4 }
  0x1a   : > { %p121_p8 = por %p120_p7, %p119_p6 }
  0x1c   : > { %p122_p9 = pnand %p121_p8, %p115_p3 }
  0x1e   : > { %125 = shalt.err (!%p122_p9)  }
  0x1f   : > { %s126_s4 = scalar_lea.vmem %s32_s22, 16  ;;  %s183_s5 = smov [#allocation2]  }
  0x20   : > { %p127_p10 = scmp.ne.s32.totalorder %s32_s22, %s126_s4  ;;  %s128_s6 = sshll.u32 %s183_s5, 4  ;;  %s129_s6 = int_to_ptr.vmem [resolvable:$false] %s128_s6 }
  0x21   : > { %s130_s7 = scalar_lea.vmem %s129_s6, 256  ;;  %p131_p11 = scmp.lt.s32.totalorder %s32_s22, %s129_s6 }
  0x22   : > { %p132_p12 = scmp.lt.s32.totalorder %s130_s7, %s126_s4 }
  0x24   : > { %p133_p13 = por %p132_p12, %p131_p11 }
  0x26   : > { %p134_p0 = pnand %p133_p13, %p127_p10 }
  0x28   : > { %137 = shalt.err (!%p134_p0)  }
  0x29   : > { %34 = dma.hbm_to_vmem [thread:$0]  %s22_s25, 16, %s32_s22, [#allocation3] }
  0x2a   : > { %s18_s19 = sadd.s32 1, %s176_s19  }
  0x2b   : > { %p15_p1 = scmp.ge.s32.totalorder %s18_s19, 16  }
  0x2c   :  { %s178_s8 = smov (%p15_p1), 0  }
  0x2d   :  { %17 = sbr.rel (!%p15_p1) target bundleno = 13 (0xd), region = 40 }
  0x34 LB: > { %170 = dma.done.wait [#allocation3], 16  ;;  %s180_s8 = sphi %s178_s8, %s40_s8  }
  0x35   : > { %171 = vsyncadd [#allocation3], 4294967280  ;;  %s40_s8 = sadd.s32 1, %s180_s8  }
  0x36   : > { %p37_p2 = scmp.ge.s32.totalorder %s40_s8, 16  }
  0x37   :  { %v43_v0 = vld [vmem:[#allocation2] sm:$0xff] (%p37_p2)  ;;  %v44_v1 = vld [vmem:[#allocation2 + $0x8] sm:$0xff] (%p37_p2)  ;;  %s184_s9 = smov (%p37_p2), [#allocation6]  }
  0x38   :  { %39 = sbr.rel (!%p37_p2) target bundleno = 52 (0x34), region = 51  ;;  %45 = vst [vmem:[#allocation6] sm:$0xff] (%p37_p2), %v43_v0  ;;  %46 = vst [vmem:[#allocation6 + $0x8] sm:$0xff] (%p37_p2), %v44_v1  ;;  %s52_s10 = sshll.u32 (%p37_p2), %s184_s9, 4  ;;  %s53_s10 = int_to_ptr.vmem [resolvable:$true] %s52_s10 }
  0x39   :  { %s138_s11 = scalar_lea.vmem (%p37_p2), %s53_s10, 256  ;;  %p143_p4 = scmp.lt.s32.totalorder (%p37_p2), %s53_s10, %s53_s10 }
  0x3a   :  { %p139_p3 = scmp.ne.s32.totalorder (%p37_p2), %s53_s10, %s138_s11  ;;  %p144_p5 = scmp.lt.s32.totalorder (%p37_p2), %s138_s11, %s138_s11 }
  0x3c   :  { %p145_p6 = por (%p37_p2), %p144_p5, %p143_p4 }
  0x3e   :  { %p146_p7 = pnand (%p37_p2), %p145_p6, %p139_p3 }
  0x40   :  { %149 = shalt.err (!%p146_p7)
}
  0x41   :  { %s150_s13 = scalar_lea.hbm %s247_s2, 256 }
  0x42   :  { %p151_p8 = scmp.ne.s32.totalorder %s247_s2, %s150_s13  ;;  %p154_p9 = scmp.lt.u32.totalorder %s150_s13, %s247_s2 }
  0x44   :  { %p156_p10 = pnand %p154_p9, %p151_p8 }
  0x46   :  { %159 = shalt.err (!%p156_p10)
}
  0x47   :  { %s185_s18 = smov 128   ;;  %s186_s19 = smov 8  }
  0x48   :  { %58 = dma.vmem_to_hbm [thread:$0]  %s53_s10, 256, %s247_s2, [#allocation7], %s185_s18, %s185_s18, %s186_s19  }
  0x49   :  { %172 = dma.done.wait [#allocation7], 256  }
  0x4a   :  { %173 = vsyncadd [#allocation7], 4294967040 }
  0x4b   :  { %62 = vsyncpa [#allocation7], 1 }
  0x4c   :  { %63 = vsyncmov [#allocation3] }
  0x4f   :  { %s64_s22 = vpop.sfrf %63 }
  0x50   :  { %p83_p11 = scmp.ne.s32.totalorder %s64_s22, 0 }
  0x52   :  { %68 = shalt.err (%p83_p11)  }

</bundles_post_ra>
